<compile_context>
chip_gen: v7x
topology: tpu7x:2x2x1
jax: 0.10.0
libtpu: 0.0.40
codegen_flags: <defaults>
</compile_context>

<pallas_src>
import functools

import jax
import jax.numpy as jnp
from jax.experimental import pallas as pl
from jax.experimental.pallas import tpu as pltpu


def _post_norm_attn_kernel(x_ref, ctx_ref, wq_ref, wkv_ref, wo_ref,
                           g_ref, b_ref, o_ref, *, dim_head, ln_eps):
    """Fused PostNorm(cross-attention) for a single batch element."""
    x = x_ref[0]            # (Nq, D)
    ctx = ctx_ref[0]        # (Nc, D)
    wq = wq_ref[...]        # (H, D, Dh)   -- already scaled by 1/sqrt(Dh)
    wkv = wkv_ref[...]      # (H, D, 2*Dh) -- fused K/V projection
    wo = wo_ref[...]        # (H, Dh, D)

    num_heads = wq.shape[0]
    nq, d = x.shape
    nc = ctx.shape[0]

    # Head-major batched projections: no per-head lane slicing, no concat,
    # no transposes inside the attention path.
    xb = jnp.broadcast_to(x, (num_heads, nq, d))
    cb = jnp.broadcast_to(ctx, (num_heads, nc, d))
    q = jnp.einsum('hqe,hef->hqf', xb, wq,
                   preferred_element_type=jnp.float32)          # (H, Nq, Dh)
    kv = jnp.einsum('hke,hef->hkf', cb, wkv,
                    preferred_element_type=jnp.float32)         # (H, Nc, 2*Dh)
    k = kv[..., :dim_head]                                      # (H, Nc, Dh)
    v = kv[..., dim_head:]                                      # (H, Nc, Dh)

    # Scaled dot-product attention with head as the leading batch dim.
    s = jnp.einsum('hqf,hkf->hqk', q, k,
                   preferred_element_type=jnp.float32)          # (H, Nq, Nc)
    m = jnp.max(s, axis=-1, keepdims=True)
    p = jnp.exp(s - m)
    denom = jnp.sum(p, axis=-1, keepdims=True)
    p = p * pl.reciprocal(denom, approx=True)                   # EUP, not VALU
    o = jnp.einsum('hqk,hkf->hqf', p, v,
                   preferred_element_type=jnp.float32)          # (H, Nq, Dh)

    # Per-head output projection, summed over heads == concat(heads) @ Wo.
    y = jnp.einsum('hqf,hfd->hqd', o, wo,
                   preferred_element_type=jnp.float32)          # (H, Nq, D)
    attn = jnp.sum(y, axis=0)                                   # (Nq, D)

    # PostNorm: residual, then LayerNorm over the feature dim.
    r = x.astype(jnp.float32) + attn
    mean = jnp.mean(r, axis=-1, keepdims=True)
    cdev = r - mean
    var = jnp.mean(cdev * cdev, axis=-1, keepdims=True)
    inv = jax.lax.rsqrt(var + ln_eps)
    out = cdev * inv * g_ref[...] + b_ref[...]                  # (1,D) bcast
    o_ref[0] = out.astype(o_ref.dtype)


def post_norm(x, context, params, *, num_heads, dim_head, ln_eps=1e-5):
    """PostNorm.forward with fn = multi-head cross-attention, fused in one call."""
    B, Nq, D = x.shape
    _, Nc, _ = context.shape
    wq, wk, wv, wo, gamma, beta = params

    # Host-side weight repacking (layout plumbing, outside the kernel):
    #  * fold 1/sqrt(dh) into Wq,
    #  * head-major (H, D, Dh) layout so the kernel never slices heads,
    #  * fuse Wk / Wv into one (H, D, 2*Dh) projection weight.
    scale = 1.0 / (dim_head ** 0.5)
    wq_h = (wq * scale).reshape(D, num_heads, dim_head).transpose(1, 0, 2)
    wk_h = wk.reshape(D, num_heads, dim_head).transpose(1, 0, 2)
    wv_h = wv.reshape(D, num_heads, dim_head).transpose(1, 0, 2)
    wkv_h = jnp.concatenate([wk_h, wv_h], axis=-1)              # (H, D, 2*Dh)
    wo_h = wo.reshape(num_heads, dim_head, D)                   # (H, Dh, D)
    g2 = gamma.reshape(1, D).astype(jnp.float32)
    b2 = beta.reshape(1, D).astype(jnp.float32)

    kern = functools.partial(_post_norm_attn_kernel,
                             dim_head=dim_head, ln_eps=ln_eps)
    return pl.pallas_call(
        kern,
        out_shape=jax.ShapeDtypeStruct((B, Nq, D), x.dtype),
        grid=(B,),
        in_specs=[
            pl.BlockSpec((1, Nq, D), lambda b: (b, 0, 0)),
            pl.BlockSpec((1, Nc, D), lambda b: (b, 0, 0)),
            pl.BlockSpec(wq_h.shape, lambda b: (0, 0, 0)),
            pl.BlockSpec(wkv_h.shape, lambda b: (0, 0, 0)),
            pl.BlockSpec(wo_h.shape, lambda b: (0, 0, 0)),
            pl.BlockSpec(g2.shape, lambda b: (0, 0)),
            pl.BlockSpec(b2.shape, lambda b: (0, 0)),
        ],
        out_specs=pl.BlockSpec((1, Nq, D), lambda b: (b, 0, 0)),
        compiler_params=pltpu.CompilerParams(
            dimension_semantics=("parallel",)),     # keeps both v7x TCs busy
    )(x, context, wq_h, wkv_h, wo_h, g2, b2)


def _reference_post_norm(x, context, params, *, num_heads, dim_head,
                         ln_eps=1e-5):
    """Pure-JAX reference of PostNorm(x, context=ctx) for correctness."""
    wq, wk, wv, wo, gamma, beta = params
    scale = 1.0 / (dim_head ** 0.5)
    q = jnp.einsum("bnd,de->bne", x, wq)
    k = jnp.einsum("bmd,de->bme", context, wk)
    v = jnp.einsum("bmd,de->bme", context, wv)
    B, Nq, _ = q.shape
    Nc = k.shape[1]
    qh = q.reshape(B, Nq, num_heads, dim_head)
    kh = k.reshape(B, Nc, num_heads, dim_head)
    vh = v.reshape(B, Nc, num_heads, dim_head)
    s = jnp.einsum("bqhd,bkhd->bhqk", qh, kh) * scale
    p = jax.nn.softmax(s, axis=-1)
    o = jnp.einsum("bhqk,bkhd->bqhd", p, vh).reshape(B, Nq, num_heads * dim_head)
    r = x + jnp.einsum("bne,ed->bnd", o, wo)
    mean = jnp.mean(r, axis=-1, keepdims=True)
    var = jnp.var(r, axis=-1, keepdims=True)
    return (r - mean) / jnp.sqrt(var + ln_eps) * gamma + beta


def _init_params(key, dim, num_heads, dim_head):
    inner = num_heads * dim_head
    k1, k2, k3, k4, k5, k6 = jax.random.split(key, 6)
    wq = 0.05 * jax.random.normal(k1, (dim, inner), jnp.float32)
    wk = 0.05 * jax.random.normal(k2, (dim, inner), jnp.float32)
    wv = 0.05 * jax.random.normal(k3, (dim, inner), jnp.float32)
    wo = 0.05 * jax.random.normal(k4, (inner, dim), jnp.float32)
    gamma = 1.0 + 0.05 * jax.random.normal(k5, (dim,), jnp.float32)
    beta = 0.05 * jax.random.normal(k6, (dim,), jnp.float32)
    return (wq, wk, wv, wo, gamma, beta)


if __name__ == "__main__":
    # Small shapes consistent with the module's usage in isanp_modules.
    B, Nq, Nc, D = 2, 8, 8, 32
    num_heads, dim_head = 4, 8

    root = jax.random.PRNGKey(0)
    k_x, k_ctx, k_par = jax.random.split(root, 3)

    x = jax.random.normal(k_x, (B, Nq, D), jnp.float32)
    context = jax.random.normal(k_ctx, (B, Nc, D), jnp.float32)
    params = _init_params(k_par, D, num_heads, dim_head)

    out = post_norm(x, context, params, num_heads=num_heads, dim_head=dim_head)
    out = jax.block_until_ready(out)

    ref = _reference_post_norm(x, context, params, num_heads=num_heads,
                               dim_head=dim_head)
    assert out.shape == (B, Nq, D)
    # Tolerance 1e-3: the softmax denominator uses the approximate EUP
    # reciprocal (per perf feedback); everything else is exact f32.
    assert jnp.allclose(out, ref, atol=1e-3, rtol=1e-3), "mismatch vs reference"

    print("KERNEL_OK")
</pallas_src>

<mosaic_0001>
module attributes {stable_mosaic.version = 11 : i64} {
  func.func @_post_norm_attn_kernel(%arg0: i32, %arg1: memref<1x8x32xf32, #tpu.memory_space<vmem>>, %arg2: memref<1x8x32xf32, #tpu.memory_space<vmem>>, %arg3: memref<4x32x8xf32, #tpu.memory_space<vmem>>, %arg4: memref<4x32x16xf32, #tpu.memory_space<vmem>>, %arg5: memref<4x8x32xf32, #tpu.memory_space<vmem>>, %arg6: memref<1x32xf32, #tpu.memory_space<vmem>>, %arg7: memref<1x32xf32, #tpu.memory_space<vmem>>, %arg8: memref<1x8x32xf32, #tpu.memory_space<vmem>>) attributes {dimension_semantics = [#tpu.dimension_semantics<parallel>], iteration_bounds = array<i64: 2>, scalar_prefetch = 0 : i64, scratch_operands = 0 : i64, tpu.core_type = #tpu.core_type<tc>, window_params = [{transform_indices = @transform_0, window_bounds = array<i64: 1, 8, 32>}, {transform_indices = @transform_1, window_bounds = array<i64: 1, 8, 32>}, {pipeline_mode = #tpu.pipeline_mode<synchronous>, transform_indices = @transform_2, window_bounds = array<i64: 4, 32, 8>}, {pipeline_mode = #tpu.pipeline_mode<synchronous>, transform_indices = @transform_3, window_bounds = array<i64: 4, 32, 16>}, {pipeline_mode = #tpu.pipeline_mode<synchronous>, transform_indices = @transform_4, window_bounds = array<i64: 4, 8, 32>}, {pipeline_mode = #tpu.pipeline_mode<synchronous>, transform_indices = @transform_5, window_bounds = array<i64: 1, 32>}, {pipeline_mode = #tpu.pipeline_mode<synchronous>, transform_indices = @transform_6, window_bounds = array<i64: 1, 32>}, {transform_indices = @transform_7, window_bounds = array<i64: 1, 8, 32>}]} {
    %c0 = arith.constant 0 : index
    %c0_0 = arith.constant 0 : index
    %c0_1 = arith.constant 0 : index
    %0 = vector.load %arg1[%c0, %c0_0, %c0_1] : memref<1x8x32xf32, #tpu.memory_space<vmem>>, vector<1x8x32xf32>
    %1 = vector.shape_cast %0 : vector<1x8x32xf32> to vector<8x32xf32>
    %c0_2 = arith.constant 0 : index
    %c0_3 = arith.constant 0 : index
    %c0_4 = arith.constant 0 : index
    %2 = vector.load %arg2[%c0_2, %c0_3, %c0_4] : memref<1x8x32xf32, #tpu.memory_space<vmem>>, vector<1x8x32xf32>
    %3 = vector.shape_cast %2 : vector<1x8x32xf32> to vector<8x32xf32>
    %c0_5 = arith.constant 0 : index
    %c0_6 = arith.constant 0 : index
    %c0_7 = arith.constant 0 : index
    %4 = vector.load %arg3[%c0_5, %c0_6, %c0_7] : memref<4x32x8xf32, #tpu.memory_space<vmem>>, vector<4x32x8xf32>
    %c0_8 = arith.constant 0 : index
    %c0_9 = arith.constant 0 : index
    %c0_10 = arith.constant 0 : index
    %5 = vector.load %arg4[%c0_8, %c0_9, %c0_10] : memref<4x32x16xf32, #tpu.memory_space<vmem>>, vector<4x32x16xf32>
    %c0_11 = arith.constant 0 : index
    %c0_12 = arith.constant 0 : index
    %c0_13 = arith.constant 0 : index
    %6 = vector.load %arg5[%c0_11, %c0_12, %c0_13] : memref<4x8x32xf32, #tpu.memory_space<vmem>>, vector<4x8x32xf32>
    %7 = vector.shape_cast %1 : vector<8x32xf32> to vector<1x8x32xf32>
    %8 = vector.broadcast %7 : vector<1x8x32xf32> to vector<4x8x32xf32>
    %9 = vector.shape_cast %3 : vector<8x32xf32> to vector<1x8x32xf32>
    %10 = vector.broadcast %9 : vector<1x8x32xf32> to vector<4x8x32xf32>
    "tpu.trace_start"() <{level = 10 : i32, message = "hqe,hef->hqf"}> : () -> ()
    %cst = arith.constant dense<0.000000e+00> : vector<4x8x8xf32>
    %11 = tpu.matmul %8, %4, %cst {dimension_numbers = #tpu.dot_dimension_numbers<[2], [1], [1], [2], [0, 0, 0, 1, 1, 2], [0], [0]>} : vector<4x8x32xf32>, vector<4x32x8xf32>, vector<4x8x8xf32> -> vector<4x8x8xf32>
    "tpu.trace_stop"() : () -> ()
    "tpu.trace_start"() <{level = 10 : i32, message = "hke,hef->hkf"}> : () -> ()
    %cst_14 = arith.constant dense<0.000000e+00> : vector<4x8x16xf32>
    %12 = tpu.matmul %10, %5, %cst_14 {dimension_numbers = #tpu.dot_dimension_numbers<[2], [1], [1], [2], [0, 0, 0, 1, 1, 2], [0], [0]>} : vector<4x8x32xf32>, vector<4x32x16xf32>, vector<4x8x16xf32> -> vector<4x8x16xf32>
    "tpu.trace_stop"() : () -> ()
    %13 = vector.extract_strided_slice %12 {offsets = [0, 0, 0], sizes = [4, 8, 8], strides = [1, 1, 1]} : vector<4x8x16xf32> to vector<4x8x8xf32>
    %14 = vector.extract_strided_slice %12 {offsets = [0, 0, 8], sizes = [4, 8, 8], strides = [1, 1, 1]} : vector<4x8x16xf32> to vector<4x8x8xf32>
    "tpu.trace_start"() <{level = 10 : i32, message = "hqf,hkf->hqk"}> : () -> ()
    %cst_15 = arith.constant dense<0.000000e+00> : vector<4x8x8xf32>
    %15 = tpu.matmul %11, %13, %cst_15 {dimension_numbers = #tpu.dot_dimension_numbers<[2], [2], [1], [1], [0, 0, 0, 1, 1, 1], [0], [0]>} : vector<4x8x8xf32>, vector<4x8x8xf32>, vector<4x8x8xf32> -> vector<4x8x8xf32>
    "tpu.trace_stop"() : () -> ()
    %cst_16 = arith.constant dense<0xFF800000> : vector<4x8xf32>
    %16 = vector.multi_reduction <maximumf>, %15, %cst_16 [2] : vector<4x8x8xf32> to vector<4x8xf32>
    %17 = vector.shape_cast %16 : vector<4x8xf32> to vector<4x8x1xf32>
    %18 = vector.broadcast %17 : vector<4x8x1xf32> to vector<4x8x8xf32>
    %19 = arith.subf %15, %18 : vector<4x8x8xf32>
    %20 = math.exp %19 : vector<4x8x8xf32>
    %cst_17 = arith.constant dense<0.000000e+00> : vector<4x8xf32>
    %21 = vector.multi_reduction <add>, %20, %cst_17 [2] : vector<4x8x8xf32> to vector<4x8xf32>
    %22 = vector.shape_cast %21 : vector<4x8xf32> to vector<4x8x1xf32>
    %23 = tpu.reciprocal %22 {approx = true} : vector<4x8x1xf32> -> vector<4x8x1xf32>
    %24 = vector.broadcast %23 : vector<4x8x1xf32> to vector<4x8x8xf32>
    %25 = arith.mulf %20, %24 : vector<4x8x8xf32>
    "tpu.trace_start"() <{level = 10 : i32, message = "hqk,hkf->hqf"}> : () -> ()
    %cst_18 = arith.constant dense<0.000000e+00> : vector<4x8x8xf32>
    %26 = tpu.matmul %25, %14, %cst_18 {dimension_numbers = #tpu.dot_dimension_numbers<[2], [1], [1], [2], [0, 0, 0, 1, 1, 2], [0], [0]>} : vector<4x8x8xf32>, vector<4x8x8xf32>, vector<4x8x8xf32> -> vector<4x8x8xf32>
    "tpu.trace_stop"() : () -> ()
    "tpu.trace_start"() <{level = 10 : i32, message = "hqf,hfd->hqd"}> : () -> ()
    %cst_19 = arith.constant dense<0.000000e+00> : vector<4x8x32xf32>
    %27 = tpu.matmul %26, %6, %cst_19 {dimension_numbers = #tpu.dot_dimension_numbers<[2], [1], [1], [2], [0, 0, 0, 1, 1, 2], [0], [0]>} : vector<4x8x8xf32>, vector<4x8x32xf32>, vector<4x8x32xf32> -> vector<4x8x32xf32>
    "tpu.trace_stop"() : () -> ()
    %cst_20 = arith.constant dense<0.000000e+00> : vector<8x32xf32>
    %28 = vector.multi_reduction <add>, %27, %cst_20 [0] : vector<4x8x32xf32> to vector<8x32xf32>
    %29 = arith.addf %1, %28 : vector<8x32xf32>
    %cst_21 = arith.constant dense<0.000000e+00> : vector<8xf32>
    %30 = vector.multi_reduction <add>, %29, %cst_21 [1] : vector<8x32xf32> to vector<8xf32>
    %31 = vector.shape_cast %30 : vector<8xf32> to vector<8x1xf32>
    %cst_22 = arith.constant 3.200000e+01 : f32
    %32 = vector.broadcast %cst_22 : f32 to vector<8x1xf32>
    %33 = arith.divf %31, %32 : vector<8x1xf32>
    %34 = vector.broadcast %33 : vector<8x1xf32> to vector<8x32xf32>
    %35 = arith.subf %29, %34 : vector<8x32xf32>
    %36 = arith.mulf %35, %35 : vector<8x32xf32>
    %cst_23 = arith.constant dense<0.000000e+00> : vector<8xf32>
    %37 = vector.multi_reduction <add>, %36, %cst_23 [1] : vector<8x32xf32> to vector<8xf32>
    %38 = vector.shape_cast %37 : vector<8xf32> to vector<8x1xf32>
    %cst_24 = arith.constant 3.200000e+01 : f32
    %39 = vector.broadcast %cst_24 : f32 to vector<8x1xf32>
    %40 = arith.divf %38, %39 : vector<8x1xf32>
    %cst_25 = arith.constant 9.99999974E-6 : f32
    %41 = vector.broadcast %cst_25 : f32 to vector<8x1xf32>
    %42 = arith.addf %40, %41 : vector<8x1xf32>
    %43 = math.rsqrt %42 : vector<8x1xf32>
    %44 = vector.broadcast %43 : vector<8x1xf32> to vector<8x32xf32>
    %45 = arith.mulf %35, %44 : vector<8x32xf32>
    %c0_26 = arith.constant 0 : index
    %c0_27 = arith.constant 0 : index
    %46 = vector.load %arg6[%c0_26, %c0_27] : memref<1x32xf32, #tpu.memory_space<vmem>>, vector<1x32xf32>
    %47 = vector.broadcast %46 : vector<1x32xf32> to vector<8x32xf32>
    %48 = arith.mulf %45, %47 : vector<8x32xf32>
    %c0_28 = arith.constant 0 : index
    %c0_29 = arith.constant 0 : index
    %49 = vector.load %arg7[%c0_28, %c0_29] : memref<1x32xf32, #tpu.memory_space<vmem>>, vector<1x32xf32>
    %50 = vector.broadcast %49 : vector<1x32xf32> to vector<8x32xf32>
    %51 = arith.addf %48, %50 : vector<8x32xf32>
    %c0_30 = arith.constant 0 : index
    %c0_31 = arith.constant 0 : index
    %c0_32 = arith.constant 0 : index
    %52 = vector.load %arg8[%c0_30, %c0_31, %c0_32] : memref<1x8x32xf32, #tpu.memory_space<vmem>>, vector<1x8x32xf32>
    %53 = vector.shape_cast %52 : vector<1x8x32xf32> to vector<8x32xf32>
    %54 = vector.shape_cast %51 : vector<8x32xf32> to vector<1x8x32xf32>
    tpu.vector_store %arg8[%c0_30, %c0_31, %c0_32], %54 {strides = array<i32>} : memref<1x8x32xf32, #tpu.memory_space<vmem>>, vector<1x8x32xf32>,
    return
  }
  func.func @transform_0(%arg0: i32) -> (i32, i32, i32) {
    %c0_i32 = arith.constant 0 : i32
    %c0_i32_0 = arith.constant 0 : i32
    %c0_i32_1 = arith.constant 0 : i32
    return %arg0, %c0_i32, %c0_i32_0 : i32, i32, i32
  }
  func.func @transform_1(%arg0: i32) -> (i32, i32, i32) {
    %c0_i32 = arith.constant 0 : i32
    %c0_i32_0 = arith.constant 0 : i32
    %c0_i32_1 = arith.constant 0 : i32
    return %arg0, %c0_i32, %c0_i32_0 : i32, i32, i32
  }
  func.func @transform_2(%arg0: i32) -> (i32, i32, i32) {
    %c0_i32 = arith.constant 0 : i32
    %c0_i32_0 = arith.constant 0 : i32
    %c0_i32_1 = arith.constant 0 : i32
    %c0_i32_2 = arith.constant 0 : i32
    return %c0_i32, %c0_i32_0, %c0_i32_1 : i32, i32, i32
  }
  func.func @transform_3(%arg0: i32) -> (i32, i32, i32) {
    %c0_i32 = arith.constant 0 : i32
    %c0_i32_0 = arith.constant 0 : i32
    %c0_i32_1 = arith.constant 0 : i32
    %c0_i32_2 = arith.constant 0 : i32
    return %c0_i32, %c0_i32_0, %c0_i32_1 : i32, i32, i32
  }
  func.func @transform_4(%arg0: i32) -> (i32, i32, i32) {
    %c0_i32 = arith.constant 0 : i32
    %c0_i32_0 = arith.constant 0 : i32
    %c0_i32_1 = arith.constant 0 : i32
    %c0_i32_2 = arith.constant 0 : i32
    return %c0_i32, %c0_i32_0, %c0_i32_1 : i32, i32, i32
  }
  func.func @transform_5(%arg0: i32) -> (i32, i32) {
    %c0_i32 = arith.constant 0 : i32
    %c0_i32_0 = arith.constant 0 : i32
    %c0_i32_1 = arith.constant 0 : i32
    return %c0_i32, %c0_i32_0 : i32, i32
  }
  func.func @transform_6(%arg0: i32) -> (i32, i32) {
    %c0_i32 = arith.constant 0 : i32
    %c0_i32_0 = arith.constant 0 : i32
    %c0_i32_1 = arith.constant 0 : i32
    return %c0_i32, %c0_i32_0 : i32, i32
  }
  func.func @transform_7(%arg0: i32) -> (i32, i32, i32) {
    %c0_i32 = arith.constant 0 : i32
    %c0_i32_0 = arith.constant 0 : i32
    %c0_i32_1 = arith.constant 0 : i32
    return %arg0, %c0_i32, %c0_i32_0 : i32, i32, i32
  }
}

</mosaic_0001>

<bundles_post_ra>
// kernel: tpu_custom_call.1
= control target key start
LH: loop header
LB: loop body
LE: loop exit
PB: predicated region body
PF: predicated region fallthrough
CT: control target
= control target key end

     0   :  { %12 = vsyncpa [#allocation3], 0  ;;  %s2774_s0 = inlined_call_operand.vmem [shape: f32[2,8,32], index: 0, kind: input, shape index: {}]   ;;  %s2775_s1 = inlined_call_operand.vmem [shape: f32[2,8,32], index: 1, kind: input, shape index: {}]   ;;  %s2776_s2 = inlined_call_operand.vmem [shape: f32[4,32,8], index: 2, kind: input, shape index: {}]   ;;  %s2777_s3 = inlined_call_operand.vmem [shape: f32[4,32,16], index: 3, kind: input, shape index: {}]   ;;  %s2778_s4 = inlined_call_operand.vmem [shape: f32[4,8,32], index: 4, kind: input, shape index: {}]   ;;  %s2779_s5 = inlined_call_operand.vmem [shape: f32[1,32], index: 5, kind: input, shape index: {}]   ;;  %s2780_s6 = inlined_call_operand.vmem [shape: f32[1,32], index: 6, kind: input, shape index: {}]   ;;  %s2781_s7 = inlined_call_operand.hbm [shape: f32[2,8,32], index: 7, kind: output, shape index: {}]  }
   0x1   :  { %14 = vsyncpa [#allocation3 + $0x1], 0  ;;  %s2432_s24 = smov 0   ;;  %s2434_s25 = smov 0  }
   0x2   :  { %s2436_s26 = smov 0   ;;  %s2438_s27 = smov 0  }
   0x3 LB: > { %s2453_s28 = sadd.s32 4294967295, %s2385_s27   ;;  %s1965_s29 = sadd.s32 4294967294, %s2385_s27   ;;  %s2385_s27 = sphi %s2438_s27, %s2787_s27   ;;  %s2381_s26 = sphi %s2436_s26, %s2786_s26   ;;  %s2377_s25 = sphi %s2434_s25, %s2785_s25   ;;  %s2373_s24 = sphi %s2432_s24, %s2784_s24  }
   0x4   : > { %s2457_s30 = sadd.s32 1, %s2385_s27   ;;  %s184_s8 = sadd.s32 1, %s2381_s26 }
   0x5   : > { %s181_s9 = ssub.s32 %s2385_s27, %s2457_s30  ;;  %p194_p0 = scmp.ne.s32.totalorder %s2381_s26, %s2377_s25 }
   0x6   : > { %p182_p1 = scmp.eq.s32.totalorder %s181_s9, 0  ;;  %p195_p2 = scmp.eq.s32.totalorder %s2453_s28, 1 }
   0x7   : > { %p200_p3 = scmp.ne.s32.totalorder %s2377_s25, %s2373_s24  ;;  %p201_p4 = scmp.eq.s32.totalorder %s1965_s29, 1 }
   0x8   : > { %s2468_s10 = scalar_select %p182_p1, %s2381_s26, %s184_s8  }
   0x9   : > { %p2470_p5 = por %p195_p2, %p194_p0  ;;  %p2474_p6 = por %p201_p4, %p200_p3 }
   0xa   : > { %p1968_p7 = scmp.ge.s32.totalorder %s2385_s27, 1  ;;  %p248_p8 = scmp.lt.s32.totalorder %s2385_s27, 3 }
   0xc   : > { %p249_p9 = pnand %p1968_p7, %p248_p8 }
   0xd   : > { %v293_v0 = vld [vmem:[%s2776_s2] sm:$0xff] (!%p249_p9)  ;;  %v294_v1 = vld [vmem:[%s2776_s2 + $0x8] sm:$0xff] (!%p249_p9)  ;;  %v2387_v3 = vmov (!%p249_p9), 0.0|0.0   ;;  %v295_v6 = vld [vmem:[%s2776_s2 + $0x10] sm:$0xff] (!%p249_p9)  ;;  %p283_p10 = scmp.lt.s32.totalorder (!%p249_p9), %s2453_s28, 1  ;;  %vm2388_vm0 = vmmov (!%p249_p9), 0  }
   0xe   : > { %252 = sbr.rel (%p249_p9) target bundleno = 1600 (0x640), region = 48  ;;  %v297_v2 = vld [vmem:[%s2776_s2 + $0x20] sm:$0xff] (!%p249_p9)  ;;  %2214 = vmatprep.subr.bf16.mxu0 (!%p249_p9), %v2387_v3  ;;  %2220 = vmatprep.subr.bf16.mxu1 (!%p249_p9), %v2387_v3  ;;  %v2215_v4 = vpack.c.bf16 (!%p249_p9), %v294_v1, %v293_v0  ;;  %v298_v5 = vld [vmem:[%s2776_s2 + $0x28] sm:$0xff] (!%p249_p9)  ;;  %v296_v7 = vld [vmem:[%s2776_s2 + $0x18] sm:$0xff] (!%p249_p9)  ;;  %v2389_v11 = vmov (!%p249_p9), 0.0   ;;  %vm329_vm1 = vcmask (!%p249_p9), 261120  }
   0xf   : > { %v2221_v8 = vpack.c.bf16 (!%p249_p9), %v298_v5, %v297_v2  ;;  %v299_v9 = vld [vmem:[%s2776_s2 + $0x30] sm:$0xff] (!%p249_p9)  ;;  %v300_v10 = vld [vmem:[%s2776_s2 + $0x38] sm:$0xff] (!%p249_p9)  ;;  %2074 = vmatprep.mubr.msk.f32.mxu0 (!%p249_p9), %vm2388_vm0, %v2389_v11  ;;  %2085 = vmatprep.mubr.msk.f32.mxu1 (!%p249_p9), %vm2388_vm0, %v2389_v11  ;;  %v2218_v12 = vpack.c.bf16 (!%p249_p9), %v296_v7, %v295_v6  ;;  %v301_v14 = vld [vmem:[%s2776_s2 + $0x40] sm:$0xff] (!%p249_p9)  ;;  %vm896_vm2 = vcmask (!%p249_p9), 64512   ;;  %s2390_s21 = smov (!%p249_p9), 120   ;;  %s280_s14 = sand.u32 (!%p249_p9), 1, %s2377_s25  }
  0x10   : > { %2216 = vmatpush3.bf16.msra.mxu0 (!%p249_p9), %v2215_v4  ;;  %v2224_v13 = vpack.c.bf16 (!%p249_p9), %v300_v10, %v299_v9  ;;  %v302_v15 = vld [vmem:[%s2776_s2 + $0x48] sm:$0xff] (!%p249_p9)  ;;  %v305_v16 = vld [vmem:[%s2776_s2 + $0x60] sm:$0xff] (!%p249_p9)  ;;  %v303_v21 = vld [vmem:[%s2776_s2 + $0x50] sm:$0xff] (!%p249_p9)  ;;  %s1969_s16 = sshll.u32 (!%p249_p9), %s280_s14, 3  ;;  %s1999_s22 = sshll.u32 (!%p249_p9), %s2453_s28, 7 }
  0x11   : > { %2222 = vmatpush3.bf16.msra.mxu1 (!%p249_p9), %v2221_v8  ;;  %2217 = vmatprep.subr.bf16.mxu0 (!%p249_p9), %v2387_v3  ;;  %v306_v17 = vld [vmem:[%s2776_s2 + $0x68] sm:$0xff] (!%p249_p9)  ;;  %v2227_v19 = vpack.c.bf16 (!%p249_p9), %v302_v15, %v301_v14  ;;  %v304_v22 = vld [vmem:[%s2776_s2 + $0x58] sm:$0xff] (!%p249_p9)  ;;  %v307_v23 = vld [vmem:[%s2776_s2 + $0x70] sm:$0xff] (!%p249_p9)  ;;  %s282_s23 = scalar_lea.vmem (!%p249_p9), [#allocation2], %s1969_s16  ;;  %s1881_s9 = scalar_lea.sflag (!%p249_p9), [#allocation3], %s280_s14 }
  0x12   : > { %2223 = vmatprep.subr.bf16.mxu1 (!%p249_p9), %v2387_v3  ;;  %v2233_v20 = vpack.c.bf16 (!%p249_p9), %v306_v17, %v305_v16  ;;  %v308_v24 = vld [vmem:[%s2776_s2 + $0x78] sm:$0xff] (!%p249_p9)  ;;  %v2230_v25 = vpack.c.bf16 (!%p249_p9), %v304_v22, %v303_v21  ;;  %v309_v27 = vld [vmem:[%s2777_s3] sm:$0xff] (!%p249_p9)  ;;  %v310_v28 = vld [vmem:[%s2777_s3 + $0x8] sm:$0xff] (!%p249_p9)  ;;  %s1894_s29 = sshll.u32 (!%p249_p9), %s282_s23, 4  ;;  %s2733_s29 = int_to_ptr.vmem [resolvable:$true] %s1894_s29 }
  0x13   : > { %v2236_v26 = vpack.c.bf16 (!%p249_p9), %v308_v24, %v307_v23  ;;  %v313_v29 = vld [vmem:[%s2777_s3 + $0x20] sm:$0xff] (!%p249_p9)  ;;  %v314_v30 = vld [vmem:[%s2777_s3 + $0x28] sm:$0xff] (!%p249_p9)  ;;  %v2239_v31 = vpack.c.bf16 (!%p249_p9), %v310_v28, %v309_v27  ;;  %v311_v33 = vld [vmem:[%s2777_s3 + $0x10] sm:$0xff] (!%p249_p9) }
  0x14   : > { %2219 = vmatpush3.bf16.msra.mxu0 (!%p249_p9), %v2218_v12  ;;  %v2245_v32 = vpack.c.bf16 (!%p249_p9), %v314_v30, %v313_v29  ;;  %v312_v34 = vld [vmem:[%s2777_s3 + $0x18] sm:$0xff] (!%p249_p9)  ;;  %v315_v35 = vld [vmem:[%s2777_s3 + $0x30] sm:$0xff] (!%p249_p9)  ;;  %v317_v39 = vld [vmem:[%s2777_s3 + $0x40] sm:$0xff] (!%p249_p9) }
  0x15   : > { %s2512_s15 = scalar_select %p283_p10, %s2453_s28, 1  ;;  %2225 = vmatpush3.bf16.msra.mxu1 %v2224_v13  ;;  %2226 = vmatprep.subr.bf16.mxu0 %v2387_v3  ;;  %v316_v36 = vld [vmem:[%s2777_s3 + $0x38] sm:$0xff]  ;;  %v2242_v37 = vpack.c.bf16 %v312_v34, %v311_v33  ;;  %v318_v40 = vld [vmem:[%s2777_s3 + $0x48] sm:$0xff]  ;;  %v321_v41 = vld [vmem:[%s2777_s3 + $0x60] sm:$0xff] }
  0x16   : > { %2232 = vmatprep.subr.bf16.mxu1 %v2387_v3  ;;  %v2248_v38 = vpack.c.bf16 %v316_v36, %v315_v35  ;;  %v322_v42 = vld [vmem:[%s2777_s3 + $0x68] sm:$0xff]  ;;  %v2251_v44 = vpack.c.bf16 %v318_v40, %v317_v39  ;;  %v319_v46 = vld [vmem:[%s2777_s3 + $0x50] sm:$0xff]  ;;  %v320_v47 = vld [vmem:[%s2777_s3 + $0x58] sm:$0xff]  ;;  %s2391_s28 = smov [#allocation2]  }
  0x17   : > { %s1970_s20 = sshll.u32 %s2512_s15, 3  ;;  %v2257_v45 = vpack.c.bf16 %v322_v42, %v321_v41  ;;  %v323_v48 = vld [vmem:[%s2777_s3 + $0x70] sm:$0xff]  ;;  %v324_v49 = vld [vmem:[%s2777_s3 + $0x78] sm:$0xff]  ;;  %v2254_v50 = vpack.c.bf16 %v320_v47, %v319_v46  ;;  %s2327_s16 = sshll.u32 %s2391_s28, 4  ;;  %s2328_s16 = int_to_ptr.vmem [resolvable:$false] %s2327_s16 }
  0x18   : > { %s286_s13 = scalar_lea.vmem %s2774_s0, %s1970_s20  ;;  %s290_s17 = scalar_lea.vmem %s2775_s1, %s1970_s20  ;;  %v2260_v51 = vpack.c.bf16 %v324_v49, %v323_v48 }
  0x19   : > { %v2534_v18 = vld [vmem:[%s286_s13] sm:$0xff]  ;;  %s2731_s20 = scalar_lea.hbm %s2781_s7, %s1999_s22  ;;  %s2323_s13 = scalar_lea.vmem %s2733_s29, 128 }
  0x1a   : > { %2075 = vmatmul.mubr.msk.f32.vlgmr.msra.gmra.mrb[0].mxu0 %vm329_vm1, %v2534_v18  ;;  %2086 = vmatmul.mubr.msk.f32.vlgmr.msra.gmra.mrb[0].mxu1 %vm329_vm1, %v2534_v18  ;;  %v292_v43 = vld [vmem:[%s290_s17] sm:$0xff]  ;;  %p2324_p11 = scmp.ne.s32.totalorder %s2733_s29, %s2323_s13  ;;  %s2329_s18 = scalar_lea.vmem %s2328_s16, 256 }
  0x1b   : > { %2228 = vmatpush3.bf16.msra.mxu0 %v2227_v19  ;;  %2234 = vmatpush3.bf16.msra.mxu1 %v2233_v20  ;;  %p2330_p0 = scmp.lt.s32.totalorder %s2733_s29, %s2328_s16  ;;  %p2331_p1 = scmp.lt.s32.totalorder %s2329_s18, %s2323_s13 }
  0x1c   : > { %2229 = vmatprep.subr.bf16.mxu0 %v2387_v3  ;;  %2235 = vmatprep.subr.bf16.mxu1 %v2387_v3  ;;  %p2325_p12 = pnand %p2324_p11, %p2470_p5 }
  0x1d   : > { %2096 = vmatprep.mubr.msk.f32.mxu0 %vm2388_vm0, %v2389_v11  ;;  %2107 = vmatprep.mubr.msk.f32.mxu1 %vm2388_vm0, %v2389_v11  ;;  %p2332_p2 = por %p2331_p1, %p2330_p0 }
  0x1e   : > { %p2326_p13 = pneg %p2325_p12 }
  0x1f   : > { %2231 = vmatpush3.bf16.msra.mxu0 %v2230_v25  ;;  %2237 = vmatpush3.bf16.msra.mxu1 %v2236_v26 }
  0x20   : > { %2238 = vmatprep.subr.bf16.mxu0 %v2387_v3  ;;  %2244 = vmatprep.subr.bf16.mxu1 %v2387_v3  ;;  %p2333_p3 = pnand %p2332_p2, %p2326_p13 }
  0x22   : > { %2097 = vmatmul.mubr.msk.f32.vlgmr.msra.gmra.mrb[2].mxu0 %vm329_vm1, %v2534_v18  ;;  %2108 = vmatmul.mubr.msk.f32.vlgmr.msra.gmra.mrb[2].mxu1 %vm329_vm1, %v2534_v18 }
  0x23   : > { %2240 = vmatpush3.bf16.msra.mxu0 %v2239_v31  ;;  %2246 = vmatpush3.bf16.msra.mxu1 %v2245_v32 }
  0x24   : > { %2241 = vmatprep.subr.bf16.mxu0 %v2387_v3  ;;  %2247 = vmatprep.subr.bf16.mxu1 %v2387_v3 }
  0x25   : > { %2118 = vmatprep.mubr.msk.f32.mxu0 %vm2388_vm0, %v2389_v11  ;;  %2129 = vmatprep.mubr.msk.f32.mxu1 %vm2388_vm0, %v2389_v11 }
  0x27   : > { %2243 = vmatpush3.bf16.msra.mxu0 %v2242_v37  ;;  %2249 = vmatpush3.bf16.msra.mxu1 %v2248_v38 }
  0x28   : > { %2250 = vmatprep.subr.bf16.mxu0 %v2387_v3  ;;  %2256 = vmatprep.subr.bf16.mxu1 %v2387_v3 }
  0x2a   : > { %2119 = vmatmul.mubr.msk.f32.vlgmr.msra.gmra.mrb[4].mxu0 %vm329_vm1, %v292_v43  ;;  %2130 = vmatmul.mubr.msk.f32.vlgmr.msra.gmra.mrb[4].mxu1 %vm329_vm1, %v292_v43 }
  0x2b   : > { %2252 = vmatpush3.bf16.msra.mxu0 %v2251_v44  ;;  %2258 = vmatpush3.bf16.msra.mxu1 %v2257_v45 }
  0x2c   : > { %2253 = vmatprep.subr.bf16.mxu0 %v2387_v3  ;;  %2259 = vmatprep.subr.bf16.mxu1 %v2387_v3 }
  0x2d   : > { %2140 = vmatprep.mubr.msk.f32.mxu0 %vm2388_vm0, %v2389_v11  ;;  %2151 = vmatprep.mubr.msk.f32.mxu1 %vm2388_vm0, %v2389_v11 }
  0x2f   : > { %2255 = vmatpush3.bf16.msra.mxu0 %v2254_v50  ;;  %2261 = vmatpush3.bf16.msra.mxu1 %v2260_v51 }
  0x30   : > { %2154 = vmatprep.subr.mxu0 %v2389_v11  ;;  %2159 = vmatprep.subr.mxu1 %v2389_v11 }
  0x32   : > { %2141 = vmatmul.mubr.msk.f32.vlgmr.msra.gmra.mrb[6].mxu0 %vm329_vm1, %v292_v43  ;;  %2152 = vmatmul.mubr.msk.f32.vlgmr.msra.gmra.mrb[6].mxu1 %vm329_vm1, %v292_v43 }
  0x33   : > { %2156 = vmatprep.mubr.msk.f32.mxu0 %vm2388_vm0, %v2389_v11  ;;  %2161 = vmatprep.mubr.msk.f32.mxu1 %vm2388_vm0, %v2389_v11 }
  0xed   : > { %v399_v52 = vpop.f32.mrb[0].mxu0  ;;  %v469_v54 = vpop.f32.mrb[0].mxu1 }
  0xee   : > { %v2076_v53 = vpop.f32.mrb[1].mxu0  ;;  %v2087_v55 = vpop.f32.mrb[1].mxu1 }
  0xef   : > { %v326_v55 = vld [vmem:[%s2778_s4 + $0x8] sm:$0xff] }
  0xf5   : > { %v539_v56 = vpop.f32.mrb[2].mxu0  ;;  %v609_v58 = vpop.f32.mrb[2].mxu1 }
  0xf6   : > { %v2098_v57 = vpop.f32.mrb[3].mxu0  ;;  %v2109_v59 = vpop.f32.mrb[3].mxu1 }
  0xf7   : > { %v328_v59 = vld [vmem:[%s2778_s4 + $0x18] sm:$0xff] }
  0xfd   : > { %v2643_v60 = vpop.f32.mrb[4].mxu0  ;;  %v752_v61 = vpop.f32.mrb[4].mxu1 }
  0xfe   : > { %v2120_v62 = vpop.f32.mrb[5].mxu0  ;;  %2155 = vmatpush3.xpose.msk.msra.mxu0 %vm896_vm2, %v2643_v60  ;;  %2160 = vmatpush3.xpose.msk.msra.mxu1 %vm896_vm2, %v752_v61  ;;  %v2131_v63 = vpop.f32.mrb[5].mxu1 }
  0xff   : > { %2164 = vmatprep.subr.mxu0 %v2389_v11  ;;  %2169 = vmatprep.subr.mxu1 %v2389_v11 }
 0x101   : > { %2157 = vmatmul.mubr.msk.f32.vlgmr.msra.gmra.mrb[8].mxu0 %vm896_vm2, %v399_v52  ;;  %2162 = vmatmul.mubr.msk.f32.vlgmr.msra.gmra.mrb[8].mxu1 %vm896_vm2, %v469_v54  ;;  %v325_v54 = vld [vmem:[%s2778_s4] sm:$0xff] }
 0x102   : > { %2166 = vmatprep.mubr.msk.f32.mxu0 %vm2388_vm0, %v2389_v11  ;;  %2171 = vmatprep.mubr.msk.f32.mxu1 %vm2388_vm0, %v2389_v11 }
 0x105   : > { %v822_v0 = vpop.f32.mrb[6].mxu0  ;;  %v892_v1 = vpop.f32.mrb[6].mxu1 }
 0x106   : > { %2165 = vmatpush3.xpose.msk.msra.mxu0 %vm896_vm2, %v822_v0  ;;  %v2142_v2 = vpop.f32.mrb[7].mxu0  ;;  %2170 = vmatpush3.xpose.msk.msra.mxu1 %vm896_vm2, %v892_v1  ;;  %v2153_v3 = vpop.f32.mrb[7].mxu1 }
 0x107   : > { %2174 = vmatprep.subr.mxu0 %v2389_v11  ;;  %2179 = vmatprep.subr.mxu1 %v2389_v11 }
 0x109   : > { %2167 = vmatmul.mubr.msk.f32.vlgmr.msra.gmra.mrb[10].mxu0 %vm896_vm2, %v539_v56  ;;  %2172 = vmatmul.mubr.msk.f32.vlgmr.msra.gmra.mrb[10].mxu1 %vm896_vm2, %v609_v58  ;;  %v327_v56 = vld [vmem:[%s2778_s4 + $0x10] sm:$0xff] }
 0x10a   : > { %2176 = vmatprep.mubr.msk.f32.mxu0 %vm2388_vm0, %v2389_v11  ;;  %2181 = vmatprep.mubr.msk.f32.mxu1 %vm2388_vm0, %v2389_v11 }
 0x1d4   : > { %v969_v4 = vpop.f32.mrb[8].mxu0  ;;  %v1045_v5 = vpop.f32.mrb[8].mxu1 }
 0x1d5   : > { %v2158_v6 = vpop.f32.mrb[9].mxu0  ;;  %v1201_v7 = vsel %vm896_vm2, %v969_v4, -inf  ;;  %v2163_v8 = vpop.f32.mrb[9].mxu1  ;;  %v1204_v9 = vsel %vm896_vm2, %v1045_v5, -inf }
 0x1d6   : > { %1202 = vmax.xlane.f32.xlu0 %v1201_v7 }
 0x1da   : > { %1205 = vmax.xlane.f32.xlu0 %v1204_v9 }
 0x1dc   : > { %v1121_v10 = vpop.f32.mrb[10].mxu0  ;;  %v1197_v12 = vpop.f32.mrb[10].mxu1 }
 0x1dd   : > { %v2168_v13 = vpop.f32.mrb[11].mxu0  ;;  %v1207_v14 = vsel %vm896_vm2, %v1121_v10, -inf  ;;  %v2173_v15 = vpop.f32.mrb[11].mxu1  ;;  %v1210_v16 = vsel %vm896_vm2, %v1197_v12, -inf }
 0x1de   : > { %1208 = vmax.xlane.f32.xlu1 %v1207_v14 }
 0x1e2   : > { %1211 = vmax.xlane.f32.xlu1 %v1210_v16 }
 0x263   : > { %v1203_v17 = vpop.xlane.xlu0 %1202 }
 0x264   : > { %v1213_v19 = vsub.f32 %v969_v4, %v1203_v17 }
 0x266   : > { %v1217_v20 = vmul.f32 1.442695, %v1213_v19 }
 0x267   : > { %v1206_v21 = vpop.xlane.xlu0 %1205 }
 0x268   : > { %2305 = vpow2.f32 %v1217_v20  ;;  %v1214_v22 = vsub.f32 %v1045_v5, %v1206_v21 }
 0x26a   : > { %v1219_v23 = vmul.f32 1.442695, %v1214_v22 }
 0x26b   : > { %v1209_v24 = vpop.xlane.xlu1 %1208 }
 0x26c   : > { %2307 = vpow2.f32 %v1219_v23  ;;  %v1215_v25 = vsub.f32 %v1121_v10, %v1209_v24 }
 0x26e   : > { %v1221_v26 = vmul.f32 1.442695, %v1215_v25 }
 0x26f   : > { %v1212_v33 = vpop.xlane.xlu1 %1211 }
 0x270   : > { %2309 = vpow2.f32 %v1221_v26  ;;  %v1216_v34 = vsub.f32 %v1197_v12, %v1212_v33 }
 0x272   : > { %v2306_v27 = vpop.eup %2305  ;;  %v1223_v35 = vmul.f32 1.442695, %v1216_v34 }
 0x273   : > { %v1225_v28 = vsel %vm896_vm2, %v2306_v27, 0.0 }
 0x274   : > { %1226 = vadd.xlane.f32.xlu0 %v1225_v28  ;;  %2311 = vpow2.f32 %v1223_v35 }
 0x276   : > { %v2308_v29 = vpop.eup %2307 }
 0x277   : > { %v1228_v30 = vsel %vm896_vm2, %v2308_v29, 0.0 }
 0x278   : > { %1229 = vadd.xlane.f32.xlu1 %v1228_v30  ;;  %v1997_v30 = vld [vmem:[%s2780_s6] ss:$0 sm:$0xff] }
 0x27a   : > { %v2310_v31 = vpop.eup %2309 }
 0x27b   : > { %v1231_v32 = vsel %vm896_vm2, %v2310_v31, 0.0 }
 0x27c   : > { %1232 = vadd.xlane.f32.xlu0 %v1231_v32 }
 0x27e   : > { %v2312_v36 = vpop.eup %2311 }
 0x27f   : > { %v1234_v37 = vsel %vm896_vm2, %v2312_v36, 0.0 }
 0x289   : > { %1321 = vrot.lane.b32.xlu1 %v752_v61, %s2390_s21 }
 0x28d   : > { %1397 = vrot.lane.b32.xlu1 %v822_v0, %s2390_s21 }
 0x292   : > { %1245 = vrot.lane.b32.xlu0 %v2643_v60, %s2390_s21 }
 0x2b1   : > { %1235 = vadd.xlane.f32.xlu1 %v1234_v37 }
 0x2c2   : > { %1473 = vrot.lane.b32.xlu1 %v892_v1, %s2390_s21 }
 0x301   : > { %v1227_v38 = vpop.xlane.xlu0 %1226 }
 0x302   : > { %2313 = vrcp.f32 %v1227_v38 }
 0x305   : > { %v1230_v39 = vpop.xlane.xlu1 %1229 }
 0x306   : > { %2315 = vrcp.f32 %v1230_v39 }
 0x309   : > { %v1233_v40 = vpop.xlane.xlu0 %1232  ;;  %v1322_v41 = vpop.permute.xlu1 %1321 }
 0x30a   : > { %2317 = vrcp.f32 %v1233_v40  ;;  %2180 = vmatpush3.msra.mxu1 %v1322_v41 }
 0x30b   : > { %2189 = vmatprep.subr.mxu1 %v2389_v11 }
 0x30c   : > { %v2314_v42 = vpop.eup %2313 }
 0x30d   : > { %v1241_v43 = vmul.f32 %v2314_v42, %v2306_v27  ;;  %v1246_v44 = vpop.permute.xlu0 %1245  ;;  %v1398_v45 = vpop.permute.xlu1 %1397 }
 0x30e   : > { %2175 = vmatpush3.msra.mxu0 %v1246_v44 }
 0x30f   : > { %2177 = vmatmul.mubr.msk.f32.vlgmr.msra.gmra.mrb[12].mxu0 %vm896_vm2, %v1241_v43  ;;  %2184 = vmatprep.subr.mxu0 %v2389_v11 }
 0x310   : > { %v2316_v46 = vpop.eup %2315  ;;  %2185 = vmatpush3.msra.mxu0 %v1398_v45  ;;  %2186 = vmatprep.mubr.msk.f32.mxu0 %vm2388_vm0, %v2389_v11 }
 0x311   : > { %v1242_v47 = vmul.f32 %v2316_v46, %v2308_v29  ;;  %2194 = vmatprep.subr.mxu0 %v2389_v11 }
 0x313   : > { %2182 = vmatmul.mubr.msk.f32.vlgmr.msra.gmra.mrb[12].mxu1 %vm896_vm2, %v1242_v47 }
 0x314   : > { %v2318_v48 = vpop.eup %2317  ;;  %2191 = vmatprep.mubr.msk.f32.mxu1 %vm2388_vm0, %v2389_v11 }
 0x315   : > { %v1243_v49 = vmul.f32 %v2318_v48, %v2310_v31 }
 0x317   : > { %2187 = vmatmul.mubr.msk.f32.vlgmr.msra.gmra.mrb[14].mxu0 %vm896_vm2, %v1243_v49 }
 0x318   : > { %2196 = vmatprep.mubr.msk.f32.mxu0 %vm2388_vm0, %v2389_v11  ;;  %2195 = vmatpush3.msra.mxu0 %v325_v54 }
 0x319   : > { %2204 = vmatprep.subr.mxu0 %v2389_v11 }
 0x33e   : > { %v1236_v50 = vpop.xlane.xlu1 %1235 }
 0x33f   : > { %2319 = vrcp.f32 %v1236_v50 }
 0x342   : > { %v1474_v51 = vpop.permute.xlu1 %1473 }
 0x343   : > { %2190 = vmatpush3.msra.mxu1 %v1474_v51 }
 0x344   : > { %2199 = vmatprep.subr.mxu1 %v2389_v11 }
 0x349   : > { %v2320_v52 = vpop.eup %2319 }
 0x34a   : > { %v1244_v53 = vmul.f32 %v2320_v52, %v2312_v36 }
 0x34c   : > { %2192 = vmatmul.mubr.msk.f32.vlgmr.msra.gmra.mrb[14].mxu1 %vm896_vm2, %v1244_v53 }
 0x34d   : > { %2201 = vmatprep.mubr.msk.f32.mxu1 %vm2388_vm0, %v2389_v11  ;;  %2200 = vmatpush3.msra.mxu1 %v326_v55 }
 0x34e   : > { %2209 = vmatprep.subr.mxu1 %v2389_v11 }
 0x3e2   : > { %v1317_v57 = vpop.f32.mrb[12].mxu0 }
 0x3e3   : > { %v2178_v58 = vpop.f32.mrb[13].mxu0  ;;  %2197 = vmatmul.mubr.msk.f32.vlgmr.msra.gmra.mrb[16].mxu0 %vm896_vm2, %v1317_v57 }
 0x3e4   : > { %2205 = vmatpush3.msra.mxu0 %v327_v56  ;;  %2206 = vmatprep.mubr.msk.f32.mxu0 %vm2388_vm0, %v2389_v11 }
 0x3e6   : > { %v1393_v60 = vpop.f32.mrb[12].mxu1 }
 0x3e7   : > { %v2183_v61 = vpop.f32.mrb[13].mxu1  ;;  %2202 = vmatmul.mubr.msk.f32.vlgmr.msra.gmra.mrb[16].mxu1 %vm896_vm2, %v1393_v60 }
 0x3e8   : > { %2210 = vmatpush3.msra.mxu1 %v328_v59  ;;  %2211 = vmatprep.mubr.msk.f32.mxu1 %vm2388_vm0, %v2389_v11 }
 0x3ea   : > { %v1469_v62 = vpop.f32.mrb[14].mxu0 }
 0x3eb   : > { %v2188_v63 = vpop.f32.mrb[15].mxu0  ;;  %2207 = vmatmul.mubr.msk.f32.vlgmr.msra.gmra.mrb[18].mxu0 %vm896_vm2, %v1469_v62 }
 0x41f   : > { %v1545_v0 = vpop.f32.mrb[14].mxu1 }
 0x420   : > { %v2193_v1 = vpop.f32.mrb[15].mxu1  ;;  %2212 = vmatmul.mubr.msk.f32.vlgmr.msra.gmra.mrb[18].mxu1 %vm896_vm2, %v1545_v0 }
 0x4b6   : > { %v1618_v2 = vpop.f32.mrb[16].mxu0 }
 0x4b7   : > { %v2198_v3 = vpop.f32.mrb[17].mxu0  ;;  %v1841_v5 = vsel %vm329_vm1, %v1618_v2, 0.0 }
 0x4ba   : > { %v1691_v4 = vpop.f32.mrb[16].mxu1 }
 0x4bb   : > { %v1842_v6 = vsel %vm329_vm1, %v1691_v4, 0.0  ;;  %v2203_v7 = vpop.f32.mrb[17].mxu1 }
 0x4bc   : > { %v1843_v8 = vadd.f32 %v1842_v6, %v1841_v5 }
 0x4be   : > { %v1764_v9 = vpop.f32.mrb[18].mxu0 }
 0x4bf   : > { %v1844_v11 = vsel %vm329_vm1, %v1764_v9, 0.0  ;;  %v2208_v10 = vpop.f32.mrb[19].mxu0 }
 0x4c0   : > { %v1845_v12 = vadd.f32 %v1844_v11, %v1843_v8 }
 0x4f3   : > { %v1837_v13 = vpop.f32.mrb[18].mxu1 }
 0x4f4   : > { %v1846_v14 = vsel %vm329_vm1, %v1837_v13, 0.0  ;;  %v2213_v15 = vpop.f32.mrb[19].mxu1 }
 0x4f5   : > { %v1847_v16 = vadd.f32 %v1846_v14, %v1845_v12 }
 0x4f7   : > { %v1848_v17 = vadd.f32 %v1847_v16, %v2534_v18  ;;  %v1996_v18 = vld [vmem:[%s2779_s5] ss:$0 sm:$0xff] }
 0x4f9   : > { %v1849_v19 = vsel %vm329_vm1, %v1848_v17, 0.0 }
 0x4fa   : > { %1850 = vadd.xlane.f32.xlu0 %v1849_v19 }
 0x587   : > { %v1851_v20 = vpop.xlane.xlu0 %1850 }
 0x588   : > { %v1853_v21 = vmul.f32 0.03125, %v1851_v20 }
 0x58a   : > { %v1854_v22 = vsub.f32 %v1848_v17, %v1853_v21 }
 0x58c   : > { %v1855_v23 = vmul.f32 %v1854_v22, %v1854_v22 }
 0x58e   : > { %v1856_v24 = vsel %vm329_vm1, %v1855_v23, 0.0 }
 0x58f   : > { %1857 = vadd.xlane.f32.xlu1 %v1856_v24 }
 0x61c   : > { %v1858_v25 = vpop.xlane.xlu1 %1857 }
 0x61d   : > { %v1859_v26 = vmul.f32 0.03125, %v1858_v25 }
 0x61f   : > { %v1860_v27 = vadd.f32 1e-05, %v1859_v26 }
 0x621   : > { %2321 = vrsqrt.f32 %v1860_v27 }
 0x62b   : > { %v2322_v28 = vpop.eup %2321 }
 0x62c   : > { %v1862_v29 = vmul.f32 %v2322_v28, %v1854_v22 }
 0x62e   : > { %v1870_v31 = vmul.f32 %v1996_v18, %v1862_v29 }
 0x630   : > { %v1878_v32 = vadd.f32 %v1997_v30, %v1870_v31 }
 0x632   : > { %1879 = vst.msk [vmem:[%s282_s23] sm:$0xff] %vm329_vm1, %v1878_v32 }
 0x633   : > { %2336 = shalt.err (!%p2333_p3)
}
 0x634   : > { %s2337_s14 = scalar_lea.hbm %s2731_s20, 128  ;;  %s2341_s21 = scalar_lea.hbm %s2781_s7, 256 }
 0x635   : > { %p2338_p4 = scmp.ne.s32.totalorder %s2731_s20, %s2337_s14  ;;  %p2342_p9 = scmp.lt.u32.totalorder %s2731_s20, %s2781_s7 }
 0x636   : > { %p2343_p10 = scmp.lt.u32.totalorder %s2341_s21, %s2337_s14  ;;  %p2345_p12 = scmp.lt.u32.totalorder %s2337_s14, %s2731_s20 }
 0x637   : > { %p2339_p7 = pnand %p2338_p4, %p2470_p5 }
 0x638   : > { %p2344_p11 = por %p2343_p10, %p2342_p9 }
 0x639   : > { %p2340_p8 = pneg %p2339_p7 }
 0x63a   : > { %p2346_p13 = por %p2345_p12, %p2344_p11 }
 0x63c   : > { %p2347_p0 = pnand %p2346_p13, %p2340_p8 }
 0x63e   : > { %2350 = shalt.err (!%p2347_p0)
}
 0x63f   : > { %2262 = dma.vmem_to_hbm [thread:$0]  (%p2470_p5), %s2733_s29, 128, %s2731_s20, %s1881_s9  }
 0x640 PF: > { %p2268_p1 = scmp.ge.s32.totalorder %s2385_s27, 2  ;;  %s1906_s15 = sand.u32 1, %s2373_s24  }
 0x641   : > { %s1907_s8 = scalar_lea.sflag [#allocation3], %s1906_s15 }
 0x642   : > { %p2265_p2 = pnand %p2268_p1, %p2474_p6 }
 0x644   : > { %2368 = dma.done.wait (!%p2265_p2), %s1907_s8, 128  }
 0x645   : > { %2370 = vsyncadd (!%p2265_p2), %s1907_s8, 4294967168  ;;  %p17_p3 = scmp.ge.s32.totalorder %s2457_s30, 4   ;;  %s2784_s24 = smov %s2377_s25 }
 0x646   : > { %s2785_s25 = smov %s2381_s26  ;;  %s2786_s26 = smov %s2468_s10 }
 0x647   : > { %s2787_s27 = smov %s2457_s30  ;;  %19 = sbr.rel (!%p17_p3) target bundleno = 3 (0x3), region = 86 }
 0x64e   :  { %1912 = vsyncpa [#allocation3], 1 }
 0x64f   :  { %1914 = vsyncpa [#allocation3 + $0x1], 1 }

</bundles_post_ra>
